<compile_context>
chip_gen: v5e
topology: v5e:2x2
jax: 0.10.0
libtpu: 0.0.40
codegen_flags: <defaults>
</compile_context>

<pallas_src>
import functools

import numpy as np
import jax
import jax.numpy as jnp
from jax.experimental import pallas as pl
from jax.experimental.pallas import tpu as pltpu

_LOG_2PI = float(np.log(2.0 * np.pi))


# ------------------------------ small helpers --------------------------------

def _round_up(x, m):
    return ((x + m - 1) // m) * m


def _pad_cols(x, target):
    pad = target - x.shape[1]
    return x if pad == 0 else jnp.pad(x, ((0, 0), (0, pad)))


def _tpu_vmem_capacity():
    """Physical VMEM bytes per core; conservative (v7x) fallback off-device."""
    try:
        return int(pltpu.get_tpu_info().vmem_capacity_bytes)
    except Exception:
        return 64 << 20


def _choose_tm(batch, requested, vmem_capacity):
    """Batch tile: multiple of 128, generation-aware cap, prefer >= 2 grid steps."""
    if requested is not None:
        assert batch % requested == 0, "tile_m must divide the batch"
        assert requested % 128 == 0 or requested == batch, \
            "tile_m must be a multiple of 128 or the full batch"
        return requested
    tm_cap = 1024 if vmem_capacity >= (96 << 20) else 512
    for min_steps in (2, 1):          # >= 2 steps keeps both v7x TCs busy
        t = min(tm_cap, (batch // min_steps) // 128 * 128)
        while t >= 128:
            if batch % t == 0:
                return t
            t -= 128
    return batch                      # un-tileable batch: single full block


def _vmem_limit_bytes(block_shapes, vmem_capacity):
    """Double-buffered f32 blocks + headroom, clamped by chip generation."""
    blk = sum(int(np.prod(s)) for s in block_shapes) * 4 * 2
    upper = (100 << 20) if vmem_capacity >= (96 << 20) else (48 << 20)
    return int(min(max(4 * blk, 16 << 20), upper))


# ----------------------------- in-kernel helpers ------------------------------

def _row_sums_to_lanes(x):
    """Per-row sum of x:(TM, Dp), returned lane-dense as (1, TM).

    ones(1, Dp) contracted against x's last dim (transposed-RHS MXU matmul,
    same pattern as q @ k.T) -> sums land along lanes, so the scalar output
    store is an unmasked lane-dense vst.
    """
    ones = jnp.ones((1, x.shape[1]), dtype=jnp.float32)
    return jax.lax.dot_general(
        ones, x, dimension_numbers=(((1,), (1,)), ((), ())),
        preferred_element_type=jnp.float32)


def _matmul_f32acc(lhs, rhs):
    return jnp.dot(lhs.astype(rhs.dtype), rhs, preferred_element_type=jnp.float32)


def _coupler_fused(cond, W, b, dp):
    """Single (TM,Cp)x(Cp,2Dp) matmul; lane-aligned slice at dp."""
    h = _matmul_f32acc(cond, W) + b
    return h[:, :dp], h[:, dp:]


# -------------------------------- kernels -------------------------------------

def log_prob_kernel(w_ref, cond_ref, W_ref, b_ref, out_ref, *, dp, const):
    shift, log_scale = _coupler_fused(cond_ref[...], W_ref[...], b_ref[...], dp)
    diff = w_ref[...] - shift
    inv_var = jnp.exp(-2.0 * log_scale)              # one EUP exp, no divide
    # log_prob = const - sum(log_scale) - 0.5*sum(diff^2 * inv_var)
    per_elem = log_scale + 0.5 * (diff * diff) * inv_var
    out_ref[...] = const - _row_sums_to_lanes(per_elem)


def sample_kernel(cond_ref, eps_ref, W_ref, b_ref, sample_ref, logp_ref, *,
                  dp, const):
    shift, log_scale = _coupler_fused(cond_ref[...], W_ref[...], b_ref[...], dp)
    eps = eps_ref[...]
    sample_ref[...] = jnp.exp(log_scale) * eps + shift
    # log_prob = const - sum(log_scale) - 0.5*sum(eps^2)   (padded eps == 0)
    per_elem = log_scale + 0.5 * eps * eps
    logp_ref[...] = const - _row_sums_to_lanes(per_elem)


def entropy_kernel(cond_ref, colsum_ref, out_ref, *, const):
    # entropy_i = sum_d log_scale_id + 0.5*D*(1+log 2pi)
    #           = cond_i . colsum(W_scale) + (sum(b_scale) + 0.5*D*(1+log 2pi))
    colsum = colsum_ref[...]
    cond = cond_ref[...].astype(colsum.dtype)
    s = jax.lax.dot_general(
        colsum, cond, dimension_numbers=(((1,), (1,)), ((), ())),
        preferred_element_type=jnp.float32)
    out_ref[...] = s + const


# ------------------------------- JAX wrapper ----------------------------------

class DiagonalGaussianConditionalDensity:
    """JAX/Pallas re-implementation with a deterministic linear coupler."""

    def __init__(self, cond_dim, event_dim, key, tile_m=None,
                 compute_dtype=jnp.float32):
        self.cond_dim = cond_dim
        self.event_dim = event_dim
        self.tile_m = tile_m
        self.compute_dtype = compute_dtype
        self.cond_dim_p = _round_up(cond_dim, 128)
        self.event_dim_p = _round_up(event_dim, 128)
        Cp, Dp = self.cond_dim_p, self.event_dim_p

        kWs, kWl, kbs, kbl = jax.random.split(key, 4)
        scale = 1.0 / np.sqrt(cond_dim)
        self.W_shift = (jax.random.normal(kWs, (cond_dim, event_dim),
                                          dtype=jnp.float32) * scale)
        self.W_scale = (jax.random.normal(kWl, (cond_dim, event_dim),
                                          dtype=jnp.float32) * scale)
        self.b_shift = (jax.random.normal(kbs, (1, event_dim),
                                          dtype=jnp.float32) * 0.01)
        self.b_scale = (jax.random.normal(kbl, (1, event_dim),
                                          dtype=jnp.float32) * 0.01)

        # fused, zero-padded, lane-aligned weight: cols [:Dp]=shift, [Dp:]=log-scale
        Wf = jnp.zeros((Cp, 2 * Dp), jnp.float32)
        Wf = Wf.at[:cond_dim, :event_dim].set(self.W_shift)
        Wf = Wf.at[:cond_dim, Dp:Dp + event_dim].set(self.W_scale)
        self.W_fused = Wf.astype(compute_dtype)
        bf = jnp.zeros((1, 2 * Dp), jnp.float32)
        bf = bf.at[:, :event_dim].set(self.b_shift)
        bf = bf.at[:, Dp:Dp + event_dim].set(self.b_scale)
        self.b_fused = bf                                     # bias stays f32

        # entropy collapsed to a matvec against precomputed column sums
        colsum = jnp.zeros((1, Cp), jnp.float32)
        colsum = colsum.at[0, :cond_dim].set(jnp.sum(self.W_scale, axis=1))
        self.colsum_scale = colsum.astype(compute_dtype)
        self.b_scale_sum = float(jnp.sum(self.b_scale))

        self._vmem_capacity = _tpu_vmem_capacity()

    # ---- mode: 'log-prob' ----
    def log_prob(self, inputs, cond_inputs):
        B, D = inputs.shape
        assert D == self.event_dim and cond_inputs.shape == (B, self.cond_dim)
        Cp, Dp = self.cond_dim_p, self.event_dim_p
        w = _pad_cols(inputs, Dp)          # zero-padded lanes contribute 0
        cond = _pad_cols(cond_inputs, Cp)
        tm = _choose_tm(B, self.tile_m, self._vmem_capacity)
        kernel = functools.partial(log_prob_kernel, dp=Dp,
                                   const=-0.5 * D * _LOG_2PI)
        out = pl.pallas_call(
            kernel,
            out_shape=jax.ShapeDtypeStruct((1, B), jnp.float32),
            grid_spec=pltpu.PrefetchScalarGridSpec(
                num_scalar_prefetch=0,
                grid=(B // tm,),
                in_specs=[pl.BlockSpec((tm, Dp), lambda i: (i, 0)),
                          pl.BlockSpec((tm, Cp), lambda i: (i, 0)),
                          pl.BlockSpec((Cp, 2 * Dp), lambda i: (0, 0)),
                          pl.BlockSpec((1, 2 * Dp), lambda i: (0, 0))],
                out_specs=pl.BlockSpec((1, tm), lambda i: (0, i))),
            compiler_params=pltpu.CompilerParams(
                dimension_semantics=("parallel",),
                vmem_limit_bytes=_vmem_limit_bytes(
                    [(tm, Dp), (tm, Cp), (Cp, 2 * Dp), (1, 2 * Dp), (1, tm)],
                    self._vmem_capacity)),
            cost_estimate=pl.CostEstimate(
                flops=int(4 * B * Cp * Dp + 10 * B * Dp),
                transcendentals=int(B * Dp),
                bytes_accessed=int(4 * (B * Dp + B * Cp + 2 * Cp * Dp
                                        + 2 * Dp + B))),
        )(w, cond, self.W_fused, self.b_fused)
        return {"log-prob": out.reshape(B, 1)}

    # ---- mode: 'sample' ----
    def sample(self, cond_inputs, key):
        B, C = cond_inputs.shape
        assert C == self.cond_dim
        D = self.event_dim
        Cp, Dp = self.cond_dim_p, self.event_dim_p
        cond = _pad_cols(cond_inputs, Cp)
        # TODO(synk): generate epsilon in-kernel with pltpu.prng_seed /
        # pltpu.stateful_normal on real TPU HW (not lowerable in interpret mode).
        eps = _pad_cols(jax.random.normal(key, (B, D), dtype=jnp.float32), Dp)
        tm = _choose_tm(B, self.tile_m, self._vmem_capacity)
        kernel = functools.partial(sample_kernel, dp=Dp,
                                   const=-0.5 * D * _LOG_2PI)
        samples, logp = pl.pallas_call(
            kernel,
            out_shape=(jax.ShapeDtypeStruct((B, Dp), jnp.float32),
                       jax.ShapeDtypeStruct((1, B), jnp.float32)),
            grid_spec=pltpu.PrefetchScalarGridSpec(
                num_scalar_prefetch=0,
                grid=(B // tm,),
                in_specs=[pl.BlockSpec((tm, Cp), lambda i: (i, 0)),
                          pl.BlockSpec((tm, Dp), lambda i: (i, 0)),
                          pl.BlockSpec((Cp, 2 * Dp), lambda i: (0, 0)),
                          pl.BlockSpec((1, 2 * Dp), lambda i: (0, 0))],
                out_specs=(pl.BlockSpec((tm, Dp), lambda i: (i, 0)),
                           pl.BlockSpec((1, tm), lambda i: (0, i)))),
            compiler_params=pltpu.CompilerParams(
                dimension_semantics=("parallel",),
                vmem_limit_bytes=_vmem_limit_bytes(
                    [(tm, Cp), (tm, Dp), (Cp, 2 * Dp), (1, 2 * Dp),
                     (tm, Dp), (1, tm)],
                    self._vmem_capacity)),
            cost_estimate=pl.CostEstimate(
                flops=int(4 * B * Cp * Dp + 10 * B * Dp),
                transcendentals=int(B * Dp),
                bytes_accessed=int(4 * (B * Cp + 2 * B * Dp + 2 * Cp * Dp
                                        + 2 * Dp + B))),
        )(cond, eps, self.W_fused, self.b_fused)
        if Dp != D:
            samples = samples[:, :D]
        return {"log-prob": logp.reshape(B, 1), "sample": samples}

    # ---- mode: 'entropy' ----
    def entropy(self, cond_inputs):
        B, C = cond_inputs.shape
        assert C == self.cond_dim
        D = self.event_dim
        Cp = self.cond_dim_p
        cond = _pad_cols(cond_inputs, Cp)
        tm = _choose_tm(B, self.tile_m, self._vmem_capacity)
        const = self.b_scale_sum + 0.5 * D * (1.0 + _LOG_2PI)
        kernel = functools.partial(entropy_kernel, const=const)
        out = pl.pallas_call(
            kernel,
            out_shape=jax.ShapeDtypeStruct((1, B), jnp.float32),
            grid_spec=pltpu.PrefetchScalarGridSpec(
                num_scalar_prefetch=0,
                grid=(B // tm,),
                in_specs=[pl.BlockSpec((tm, Cp), lambda i: (i, 0)),
                          pl.BlockSpec((1, Cp), lambda i: (0, 0))],
                out_specs=pl.BlockSpec((1, tm), lambda i: (0, i))),
            compiler_params=pltpu.CompilerParams(
                dimension_semantics=("parallel",),
                vmem_limit_bytes=_vmem_limit_bytes(
                    [(tm, Cp), (1, Cp), (1, tm)], self._vmem_capacity)),
            cost_estimate=pl.CostEstimate(
                flops=int(2 * B * Cp + 2 * B),
                transcendentals=0,
                bytes_accessed=int(4 * (B * Cp + Cp + B))),
        )(cond, self.colsum_scale)
        return out.reshape(B, 1)


# ----------------------------------- main --------------------------------------

if __name__ == "__main__":
    key = jax.random.PRNGKey(0)
    k_param, k_cond, k_w, k_eps = jax.random.split(key, 4)

    # small but tiling-exercising shapes: 2 batch tiles of 128 rows,
    # C=D=64 exercises the 128-padding path.
    B, C, D = 256, 64, 64
    TM = 128
    density = DiagonalGaussianConditionalDensity(C, D, k_param, tile_m=TM)

    cond_inputs = jax.random.normal(k_cond, (B, C), dtype=jnp.float32)
    inputs = jax.random.normal(k_w, (B, D), dtype=jnp.float32)

    # pure-JAX reference for the coupler / density math
    shift_ref = cond_inputs @ density.W_shift + density.b_shift
    log_scale_ref = cond_inputs @ density.W_scale + density.b_scale
    stddev_ref = jnp.exp(log_scale_ref)
    var_ref = stddev_ref ** 2

    # --- log-prob ---
    lp = density.log_prob(inputs, cond_inputs)["log-prob"]
    jax.block_until_ready(lp)
    ref_lp = (-0.5 * D * np.log(2 * np.pi)
              - 0.5 * jnp.sum(jnp.log(var_ref), axis=1, keepdims=True)
              - 0.5 * jnp.sum((inputs - shift_ref) ** 2 / var_ref,
                              axis=1, keepdims=True))
    np.testing.assert_allclose(np.asarray(lp), np.asarray(ref_lp),
                               rtol=1e-4, atol=1e-3)

    # --- sample ---
    out = density.sample(cond_inputs, k_eps)
    samples, slp = out["sample"], out["log-prob"]
    jax.block_until_ready(samples)
    jax.block_until_ready(slp)
    assert samples.shape == (B, D)
    assert slp.shape == (B, 1)
    # consistency: returned log-prob must match the reparameterised formula
    eps_implied = (samples - shift_ref) / stddev_ref
    ref_slp = (-0.5 * D * np.log(2 * np.pi)
               - jnp.sum(log_scale_ref, axis=1, keepdims=True)
               - 0.5 * jnp.sum(eps_implied ** 2, axis=1, keepdims=True))
    np.testing.assert_allclose(np.asarray(slp), np.asarray(ref_slp),
                               rtol=1e-4, atol=1e-3)
    # loose sanity check that epsilon ~ N(0, 1)
    eps_mean = float(jnp.mean(eps_implied))
    eps_std = float(jnp.std(eps_implied))
    assert abs(eps_mean) < 0.1 and abs(eps_std - 1.0) < 0.1, (eps_mean, eps_std)

    # --- entropy ---
    ent = density.entropy(cond_inputs)
    jax.block_until_ready(ent)
    ref_ent = (jnp.sum(log_scale_ref, axis=1, keepdims=True)
               + 0.5 * D * (1.0 + np.log(2 * np.pi)))
    np.testing.assert_allclose(np.asarray(ent), np.asarray(ref_ent),
                               rtol=1e-4, atol=1e-4)

    print("KERNEL_OK")
</pallas_src>

<mosaic_0001>
module attributes {stable_mosaic.version = 11 : i64} {
  func.func @log_prob_kernel(%arg0: i32, %arg1: memref<128x128xf32, #tpu.memory_space<vmem>>, %arg2: memref<128x128xf32, #tpu.memory_space<vmem>>, %arg3: memref<128x256xf32, #tpu.memory_space<vmem>>, %arg4: memref<1x256xf32, #tpu.memory_space<vmem>>, %arg5: memref<1x128xf32, #tpu.memory_space<vmem>>) attributes {dimension_semantics = [#tpu.dimension_semantics<parallel>], iteration_bounds = array<i64: 2>, scalar_prefetch = 0 : i64, scratch_operands = 0 : i64, tpu.core_type = #tpu.core_type<tc>, window_params = [{transform_indices = @transform_0, window_bounds = array<i64: 128, 128>}, {transform_indices = @transform_1, window_bounds = array<i64: 128, 128>}, {pipeline_mode = #tpu.pipeline_mode<synchronous>, transform_indices = @transform_2, window_bounds = array<i64: 128, 256>}, {pipeline_mode = #tpu.pipeline_mode<synchronous>, transform_indices = @transform_3, window_bounds = array<i64: 1, 256>}, {transform_indices = @transform_4, window_bounds = array<i64: 1, 128>}]} {
    %c0 = arith.constant 0 : index
    %c0_0 = arith.constant 0 : index
    %0 = vector.load %arg2[%c0, %c0_0] : memref<128x128xf32, #tpu.memory_space<vmem>>, vector<128x128xf32>
    %c0_1 = arith.constant 0 : index
    %c0_2 = arith.constant 0 : index
    %1 = vector.load %arg3[%c0_1, %c0_2] : memref<128x256xf32, #tpu.memory_space<vmem>>, vector<128x256xf32>
    %c0_3 = arith.constant 0 : index
    %c0_4 = arith.constant 0 : index
    %2 = vector.load %arg4[%c0_3, %c0_4] : memref<1x256xf32, #tpu.memory_space<vmem>>, vector<1x256xf32>
    %cst = arith.constant dense<0.000000e+00> : vector<128x256xf32>
    %3 = tpu.matmul %0, %1, %cst {dimension_numbers = #tpu.dot_dimension_numbers<[1], [0], [0], [1], [0, 0, 1, 1], [], []>} : vector<128x128xf32>, vector<128x256xf32>, vector<128x256xf32> -> vector<128x256xf32>
    %4 = vector.broadcast %2 : vector<1x256xf32> to vector<128x256xf32>
    %5 = arith.addf %3, %4 : vector<128x256xf32>
    %6 = vector.extract_strided_slice %5 {offsets = [0, 0], sizes = [128, 128], strides = [1, 1]} : vector<128x256xf32> to vector<128x128xf32>
    %7 = vector.extract_strided_slice %5 {offsets = [0, 128], sizes = [128, 128], strides = [1, 1]} : vector<128x256xf32> to vector<128x128xf32>
    %c0_5 = arith.constant 0 : index
    %c0_6 = arith.constant 0 : index
    %8 = vector.load %arg1[%c0_5, %c0_6] : memref<128x128xf32, #tpu.memory_space<vmem>>, vector<128x128xf32>
    %9 = arith.subf %8, %6 : vector<128x128xf32>
    %cst_7 = arith.constant -2.000000e+00 : f32
    %10 = vector.broadcast %cst_7 : f32 to vector<128x128xf32>
    %11 = arith.mulf %10, %7 : vector<128x128xf32>
    %12 = math.exp %11 : vector<128x128xf32>
    %13 = arith.mulf %9, %9 : vector<128x128xf32>
    %cst_8 = arith.constant 5.000000e-01 : f32
    %14 = vector.broadcast %cst_8 : f32 to vector<128x128xf32>
    %15 = arith.mulf %14, %13 : vector<128x128xf32>
    %16 = arith.mulf %15, %12 : vector<128x128xf32>
    %17 = arith.addf %7, %16 : vector<128x128xf32>
    %cst_9 = arith.constant 1.000000e+00 : f32
    %18 = vector.broadcast %cst_9 : f32 to vector<1x128xf32>
    %cst_10 = arith.constant dense<0.000000e+00> : vector<1x128xf32>
    %19 = tpu.matmul %18, %17, %cst_10 {dimension_numbers = #tpu.dot_dimension_numbers<[1], [1], [0], [0], [0, 0, 1, 0], [], []>} : vector<1x128xf32>, vector<128x128xf32>, vector<1x128xf32> -> vector<1x128xf32>
    %cst_11 = arith.constant -58.8120651 : f32
    %20 = vector.broadcast %cst_11 : f32 to vector<1x128xf32>
    %21 = arith.subf %20, %19 : vector<1x128xf32>
    %c0_12 = arith.constant 0 : index
    %c0_13 = arith.constant 0 : index
    %22 = vector.load %arg5[%c0_12, %c0_13] : memref<1x128xf32, #tpu.memory_space<vmem>>, vector<1x128xf32>
    tpu.vector_store %arg5[%c0_12, %c0_13], %21 {strides = array<i32>} : memref<1x128xf32, #tpu.memory_space<vmem>>, vector<1x128xf32>,
    return
  }
  func.func @transform_0(%arg0: i32) -> (i32, i32) {
    %c0_i32 = arith.constant 0 : i32
    %c0_i32_0 = arith.constant 0 : i32
    return %arg0, %c0_i32 : i32, i32
  }
  func.func @transform_1(%arg0: i32) -> (i32, i32) {
    %c0_i32 = arith.constant 0 : i32
    %c0_i32_0 = arith.constant 0 : i32
    return %arg0, %c0_i32 : i32, i32
  }
  func.func @transform_2(%arg0: i32) -> (i32, i32) {
    %c0_i32 = arith.constant 0 : i32
    %c0_i32_0 = arith.constant 0 : i32
    %c0_i32_1 = arith.constant 0 : i32
    return %c0_i32, %c0_i32_0 : i32, i32
  }
  func.func @transform_3(%arg0: i32) -> (i32, i32) {
    %c0_i32 = arith.constant 0 : i32
    %c0_i32_0 = arith.constant 0 : i32
    %c0_i32_1 = arith.constant 0 : i32
    return %c0_i32, %c0_i32_0 : i32, i32
  }
  func.func @transform_4(%arg0: i32) -> (i32, i32) {
    %c0_i32 = arith.constant 0 : i32
    %c0_i32_0 = arith.constant 0 : i32
    return %c0_i32, %arg0 : i32, i32
  }
}

</mosaic_0001>

<bundles_post_ra>
// kernel: tpu_custom_call.1
= control target key start
LH: loop header
LB: loop body
LE: loop exit
PB: predicated region body
PF: predicated region fallthrough
CT: control target
= control target key end

     0   :  { %s1386_s0 = inlined_call_operand.hbm [shape: f32[256,128], index: 0, kind: input, shape index: {}]   ;;  %s1387_s1 = inlined_call_operand.hbm [shape: f32[256,128], index: 1, kind: input, shape index: {}]   ;;  %s1388_s2 = inlined_call_operand.hbm [shape: f32[128,256], index: 2, kind: input, shape index: {}]   ;;  %s1389_s3 = inlined_call_operand.vmem [shape: f32[1,256], index: 3, kind: input, shape index: {}]   ;;  %s1390_s4 = inlined_call_operand.hbm [shape: f32[1,256], index: 4, kind: output, shape index: {}]  }
   0x1   :  { %1391 = sst [smem:[#allocation14_spill]] %s1386_s0 }
   0x2   :  { %1392 = sst [smem:[#allocation15_spill]] %s1388_s2 }
   0x3   :  { %9 = vsyncpa [#allocation3], 0 }
   0x4   :  { %11 = vsyncpa [#allocation3 + $0x1], 0 }
   0x5   :  { %12 = vsyncpa [#allocation6], 0 }
   0x6   :  { %14 = vsyncpa [#allocation6 + $0x1], 0 }
   0x7   :  { %15 = vsyncpa [#allocation4], 0 }
   0x8   :  { %17 = vsyncpa [#allocation4 + $0x1], 0  ;;  %s1068_s15 = smov 0   ;;  %s1070_s16 = smov 0  }
   0x9   :  { %s1072_s17 = smov 0   ;;  %s1074_s18 = smov 0  }
   0xa LB: > { %s1089_s19 = sadd.s32 4294967295, %s1035_s18   ;;  %s738_s20 = sadd.s32 4294967294, %s1035_s18   ;;  %s1035_s18 = sphi %s1074_s18, %s1406_s18   ;;  %s1031_s17 = sphi %s1072_s17, %s1405_s17   ;;  %s1027_s16 = sphi %s1070_s16, %s1404_s16   ;;  %s1023_s15 = sphi %s1068_s15, %s1403_s15  }
   0xb   : > { %p43_p0 = scmp.ne.s32.totalorder %s1027_s16, %s1023_s15  ;;  %p44_p1 = scmp.eq.s32.totalorder %s1089_s19, 0 }
   0xc   : > { %p135_p2 = scmp.eq.s32.totalorder %s1089_s19, 1  ;;  %p141_p3 = scmp.eq.s32.totalorder %s738_s20, 1 }
   0xd   : > { %p1098_p4 = por %p44_p1, %p43_p0  ;;  %p739_p5 = scmp.ge.s32.totalorder %s1035_s18, 1 }
   0xe   : > { %p1103_p6 = por %p141_p3, %p43_p0  ;;  %p148_p7 = scmp.lt.s32.totalorder %s1035_s18, 3 }
   0xf   : > { %s1395_s2 = sld [smem:[#allocation15_spill]]  ;;  %s1037_s27 = smov [#allocation7]  }
  0x10   : > { %p1111_p8 = pnand %p739_p5, %p148_p7  ;;  %s161_s28 = sshll.u32 %s1037_s27, 4  ;;  %s162_s28 = int_to_ptr.vmem [resolvable:$true] %s161_s28 }
  0x11   : > { %s1121_s29 = sadd.s32 1, %s1035_s18   ;;  %s1038_s30 = smov 256  }
  0x12   : > { %p782_p9 = pneg %p1111_p8  ;;  %s1039_s5 = smov 16  }
  0x13   : > { %s27_s6 = ssub.s32 %s1035_s18, %s1121_s29  ;;  %s30_s7 = sadd.s32 1, %s1031_s17 }
  0x14   : > { %p783_p10 = pnand %p782_p9, %p44_p1  ;;  %p28_p12 = scmp.eq.s32.totalorder %s27_s6, 0 }
  0x15   : > { %s159_s25 = sshll.u32 %s1395_s2, 4  ;;  %p37_p13 = scmp.ne.s32.totalorder %s1031_s17, %s1027_s16  ;;  %s160_s25 = int_to_ptr.hbm [resolvable:$true] %s159_s25 }
  0x16   : > { %785 = dma.hbm_to_vmem [thread:$0]  (!%p783_p10), %s160_s25, 4096, %s162_s28, [#allocation6], %s1038_s30, %s1038_s30, %s1039_s5  }
  0x17   : > { %p38_p0 = scmp.eq.s32.totalorder %s1035_s18, 0  ;;  %p798_p3 = scmp.lt.s32.totalorder %s1035_s18, 2 }
  0x18   : > { %s1131_s8 = scalar_select %p28_p12, %s1031_s17, %s30_s7  }
  0x19   : > { %p39_p5 = por %p38_p0, %p37_p13  ;;  %p1135_p7 = por %p135_p2, %p37_p13 }
  0x1a   : > { %1397 = sst [smem:[#allocation13_spill]] %s1131_s8  ;;  %s178_s10 = sand.u32 1, %s1031_s17  }
  0x1b   : > { %s754_s11 = sshll.u32 %s1035_s18, 7  ;;  %s1141_s12 = sshll.u32 %s178_s10, 7 }
  0x1c   : > { %s1399_s0 = sld [smem:[#allocation14_spill]]  ;;  %s182_s24 = scalar_lea.vmem [#allocation2], %s1141_s12 }
  0x1d   : > { %s190_s25 = sshll.u32 %s182_s24, 4  ;;  %p1149_p9 = pnand %p798_p3, %p39_p5  ;;  %s191_s25 = int_to_ptr.vmem [resolvable:$true] %s190_s25 }
  0x1e   : > { %s209_s5 = scalar_lea.hbm %s1387_s1, %s754_s11  ;;  %s179_s6 = scalar_lea.sflag [#allocation3], %s178_s10 }
  0x1f   : > { %p905_p10 = pneg %p1149_p9 }
  0x22   : > { %s187_s20 = scalar_lea.hbm %s1399_s0, %s754_s11  ;;  %s908_s24 = scalar_lea.hbm %s1399_s0, 256 }
  0x23   : > { %s188_s23 = sshll.u32 %s187_s20, 4  ;;  %s189_s23 = int_to_ptr.hbm [resolvable:$true] %s188_s23 }
  0x24   : > { %s901_s7 = sshra.s32 %s189_s23, 4  ;;  %s902_s7 = int_to_ptr.hbm [resolvable:$true] %s901_s7 }
  0x25   : > { %s903_s13 = scalar_lea.hbm %s902_s7, 128  ;;  %p909_p0 = scmp.lt.s32.totalorder %s902_s7, %s1399_s0 }
  0x26   : > { %p904_p2 = scmp.ne.s32.totalorder %s902_s7, %s903_s13  ;;  %p910_p3 = scmp.lt.s32.totalorder %s908_s24, %s903_s13 }
  0x28   : > { %p906_p12 = pnand %p905_p10, %p904_p2  ;;  %p911_p5 = por %p910_p3, %p909_p0 }
  0x2a   : > { %p907_p13 = pneg %p906_p12 }
  0x2c   : > { %p912_p11 = pnand %p911_p5, %p907_p13 }
  0x2e   : > { %915 = shalt.err (!%p912_p11)
}
  0x2f   : > { %s1040_s10 = smov 128   ;;  %s1041_s11 = smov 8  }
  0x30   : > { %789 = dma.hbm_to_vmem [thread:$0]  (!%p1149_p9), %s189_s23, 2048, %s191_s25, %s179_s6, %s1040_s10, %s1040_s10, %s1041_s11  }
  0x31   : > { %s210_s30 = sshll.u32 %s209_s5, 4  ;;  %s204_s8 = scalar_lea.vmem [#allocation5], %s1141_s12  ;;  %s211_s30 = int_to_ptr.hbm [resolvable:$true] %s210_s30 }
  0x32   : > { %s212_s14 = sshll.u32 %s204_s8, 4  ;;  %s200_s20 = sand.u32 1, %s1035_s18   ;;  %s213_s14 = int_to_ptr.vmem [resolvable:$true] %s212_s14 }
  0x33   : > { %s201_s2 = scalar_lea.sflag [#allocation6], %s200_s20  ;;  %s931_s7 = sshra.s32 %s211_s30, 4  ;;  %s932_s7 = int_to_ptr.hbm [resolvable:$true] %s931_s7 }
  0x34   : > { %s933_s13 = scalar_lea.hbm %s932_s7, 128  ;;  %s938_s0 = scalar_lea.hbm %s1387_s1, 256 }
  0x35   : > { %p934_p2 = scmp.ne.s32.totalorder %s932_s7, %s933_s13  ;;  %p939_p13 = scmp.lt.s32.totalorder %s932_s7, %s1387_s1 }
  0x36   : > { %p940_p0 = scmp.lt.s32.totalorder %s938_s0, %s933_s13 }
  0x37   : > { %p936_p11 = pnand %p934_p2, %p905_p10 }
  0x38   : > { %p941_p3 = por %p940_p0, %p939_p13 }
  0x39   : > { %p937_p12 = pneg %p936_p11 }
  0x3b   : > { %p942_p5 = pnand %p941_p3, %p937_p12 }
  0x3d   : > { %945 = shalt.err (!%p942_p5)
}
  0x3e   : > { %792 = dma.hbm_to_vmem [thread:$0]  (!%p1149_p9), %s211_s30, 2048, %s213_s14, %s201_s2, %s1040_s10, %s1040_s10, %s1041_s11  }
  0x3f   : > { %224 = sbr.rel (%p1111_p8) target bundleno = 569 (0x239), region = 36  ;;  %s1185_s8 = sand.u32 (!%p1111_p8), 1, %s1027_s16  }
  0x40   : > { %s749_s12 = sshll.u32 (!%p1111_p8), %s1185_s8, 7  ;;  %s227_s5 = scalar_lea.sflag (!%p1111_p8), [#allocation3], %s1185_s8 }
  0x41   : > { %s1189_s6 = scalar_lea.vmem (!%p1111_p8), [#allocation2], %s749_s12 }
  0x44   : > { %1006 = dma.done.wait (%p1098_p4), %s227_s5, 2048  }
  0x45   : > { %1008 = vsyncadd (%p1098_p4), %s227_s5, 4294965248  ;;  %s236_s0 = sand.u32 1, %s1089_s19   ;;  %s1196_s27 = scalar_lea.vmem [#allocation5], %s749_s12 }
  0x46   : > { %s237_s26 = scalar_lea.sflag [#allocation6], %s236_s0 }
  0x47   : > { %1010 = dma.done.wait (%p1098_p4), %s237_s26, 2048  }
  0x48   : > { %1012 = vsyncadd (%p1098_p4), %s237_s26, 4294965248 }
  0x49   : > { %1014 = dma.done.wait (%p44_p1), [#allocation6], 4096  }
  0x4a   : > { %1016 = vsyncadd (%p44_p1), [#allocation6], 4294963200  ;;  %v324_v0 = vld [vmem:[#allocation7 + $0xf8] sm:$0xff]  ;;  %v322_v1 = vld [vmem:[#allocation7 + $0xe8] sm:$0xff]  ;;  %s636_s14 = scalar_lea.hbm %s1390_s4, %s1089_s19  ;;  %s274_s20 = scalar_lea.vmem [#allocation8], %s1185_s8 }
  0x4b   : > { %396 = vmatpush.msra.mxu1 %v324_v0  ;;  %v323_v2 = vld [vmem:[#allocation7 + $0xf0] sm:$0xff]  ;;  %v321_v3 = vld [vmem:[#allocation7 + $0xe0] sm:$0xff]  ;;  %v320_v4 = vld [vmem:[#allocation7 + $0xd8] sm:$0xff]  ;;  %s638_s2 = sshll.u32 %s274_s20, 4  ;;  %s640_s7 = sshll.u32 %s636_s14, 4  ;;  %s639_s2 = int_to_ptr.vmem [resolvable:$true] %s638_s2  ;;  %s641_s7 = int_to_ptr.hbm [resolvable:$true] %s640_s7 }
  0x4c   : > { %331 = vmatpush.msra.mxu0 %v323_v2  ;;  %756 = vmatpush.msra.mxu3 %v323_v2  ;;  %v319_v5 = vld [vmem:[#allocation7 + $0xd0] sm:$0xff]  ;;  %v318_v6 = vld [vmem:[#allocation7 + $0xc8] sm:$0xff]  ;;  %v317_v7 = vld [vmem:[#allocation7 + $0xc0] sm:$0xff]  ;;  %s628_s13 = scalar_lea.sflag [#allocation4], %s1185_s8  ;;  %s975_s24 = sshra.s32 %s641_s7, 4  ;;  %s976_s24 = int_to_ptr.hbm [resolvable:$true] %s975_s24 }
  0x4d   : > { %397 = vmatpush.msra.mxu1 %v322_v1  ;;  %v316_v8 = vld [vmem:[#allocation7 + $0xb8] sm:$0xff]  ;;  %v315_v9 = vld [vmem:[#allocation7 + $0xb0] sm:$0xff]  ;;  %v314_v10 = vld [vmem:[#allocation7 + $0xa8] sm:$0xff]  ;;  %s977_s28 = scalar_lea.hbm %s976_s24, 1  ;;  %s981_s19 = scalar_lea.hbm %s1390_s4, 2 }
  0x4e   : > { %332 = vmatpush.msra.mxu0 %v321_v3  ;;  %757 = vmatpush.msra.mxu3 %v321_v3  ;;  %v313_v11 = vld [vmem:[#allocation7 + $0xa0] sm:$0xff]  ;;  %v312_v12 = vld [vmem:[#allocation7 + $0x98] sm:$0xff]  ;;  %v311_v13 = vld [vmem:[#allocation7 + $0x90] sm:$0xff]  ;;  %p978_p1 = scmp.ne.s32.totalorder %s976_s24, %s977_s28  ;;  %p982_p9 = scmp.lt.s32.totalorder %s976_s24, %s1390_s4 }
  0x4f   : > { %398 = vmatpush.msra.mxu1 %v320_v4  ;;  %v310_v14 = vld [vmem:[#allocation7 + $0x88] sm:$0xff]  ;;  %v309_v15 = vld [vmem:[#allocation7 + $0x80] sm:$0xff]  ;;  %v308_v16 = vld [vmem:[#allocation7 + $0x78] sm:$0xff]  ;;  %p983_p10 = scmp.lt.s32.totalorder %s981_s19, %s977_s28 }
  0x50   : > { %333 = vmatpush.msra.mxu0 %v319_v5  ;;  %758 = vmatpush.msra.mxu3 %v319_v5  ;;  %v307_v17 = vld [vmem:[#allocation7 + $0x70] sm:$0xff]  ;;  %v306_v18 = vld [vmem:[#allocation7 + $0x68] sm:$0xff]  ;;  %v305_v19 = vld [vmem:[#allocation7 + $0x60] sm:$0xff]  ;;  %p979_p4 = pnand %p978_p1, %p1135_p7 }
  0x51   : > { %399 = vmatpush.msra.mxu1 %v318_v6  ;;  %v304_v20 = vld [vmem:[#allocation7 + $0x58] sm:$0xff]  ;;  %v303_v21 = vld [vmem:[#allocation7 + $0x50] sm:$0xff]  ;;  %v302_v22 = vld [vmem:[#allocation7 + $0x48] sm:$0xff]  ;;  %p984_p2 = por %p983_p10, %p982_p9 }
  0x52   : > { %334 = vmatpush.msra.mxu0 %v317_v7  ;;  %759 = vmatpush.msra.mxu3 %v317_v7  ;;  %v301_v23 = vld [vmem:[#allocation7 + $0x40] sm:$0xff]  ;;  %v300_v24 = vld [vmem:[#allocation7 + $0x38] sm:$0xff]  ;;  %v299_v25 = vld [vmem:[#allocation7 + $0x30] sm:$0xff]  ;;  %p980_p8 = pneg %p979_p4 }
  0x53   : > { %400 = vmatpush.msra.mxu1 %v316_v8  ;;  %v298_v26 = vld [vmem:[#allocation7 + $0x28] sm:$0xff]  ;;  %v297_v27 = vld [vmem:[#allocation7 + $0x20] sm:$0xff]  ;;  %v296_v28 = vld [vmem:[#allocation7 + $0x18] sm:$0xff] }
  0x54   : > { %335 = vmatpush.msra.mxu0 %v315_v9  ;;  %760 = vmatpush.msra.mxu3 %v315_v9  ;;  %v295_v29 = vld [vmem:[#allocation7 + $0x10] sm:$0xff]  ;;  %v294_v30 = vld [vmem:[#allocation7 + $0x8] sm:$0xff]  ;;  %v277_v31 = vld [vmem:[%s1196_s27] sm:$0xff]  ;;  %p985_p11 = pnand %p984_p2, %p980_p8 }
  0x55   : > { %401 = vmatpush.msra.mxu1 %v314_v10  ;;  %v293_v32 = vld [vmem:[#allocation7] sm:$0xff]  ;;  %v278_v33 = vld [vmem:[%s1196_s27 + $0x8] sm:$0xff]  ;;  %v279_v34 = vld [vmem:[%s1196_s27 + $0x10] sm:$0xff] }
  0x56   : > { %336 = vmatpush.msra.mxu0 %v313_v11  ;;  %761 = vmatpush.msra.mxu3 %v313_v11  ;;  %v280_v35 = vld [vmem:[%s1196_s27 + $0x18] sm:$0xff]  ;;  %v281_v36 = vld [vmem:[%s1196_s27 + $0x20] sm:$0xff]  ;;  %v282_v37 = vld [vmem:[%s1196_s27 + $0x28] sm:$0xff] }
  0x57   : > { %402 = vmatpush.msra.mxu1 %v312_v12  ;;  %v287_v38 = vld [vmem:[%s1196_s27 + $0x50] sm:$0xff]  ;;  %v288_v40 = vld [vmem:[%s1196_s27 + $0x58] sm:$0xff]  ;;  %v289_v42 = vld [vmem:[%s1196_s27 + $0x60] sm:$0xff] }
  0x58   : > { %337 = vmatpush.msra.mxu0 %v311_v13  ;;  %762 = vmatpush.msra.mxu3 %v311_v13  ;;  %v283_v39 = vld [vmem:[%s1196_s27 + $0x30] sm:$0xff]  ;;  %v284_v41 = vld [vmem:[%s1196_s27 + $0x38] sm:$0xff]  ;;  %v285_v43 = vld [vmem:[%s1196_s27 + $0x40] sm:$0xff] }
  0x59   : > { %403 = vmatpush.msra.mxu1 %v310_v14  ;;  %v290_v44 = vld [vmem:[%s1196_s27 + $0x68] sm:$0xff]  ;;  %v291_v46 = vld [vmem:[%s1196_s27 + $0x70] sm:$0xff]  ;;  %v292_v47 = vld [vmem:[%s1196_s27 + $0x78] sm:$0xff] }
  0x5a   : > { %338 = vmatpush.msra.mxu0 %v309_v15  ;;  %763 = vmatpush.msra.mxu3 %v309_v15  ;;  %v286_v45 = vld [vmem:[%s1196_s27 + $0x48] sm:$0xff]  ;;  %v325_v48 = vld [vmem:[%s1389_s3] sm:$0x3]  ;;  %v463_v12 = vld [vmem:[%s1189_s6 + $0x10] sm:$0xff] }
  0x5b   : > { %404 = vmatpush.msra.mxu1 %v308_v16  ;;  %v1225_v49 = vperm.slane %v325_v48, 1  ;;  %v1227_v50 = vperm.slane %v325_v48, 0  ;;  %v461_v54 = vld [vmem:[%s1189_s6] sm:$0xff]  ;;  %v462_v63 = vld [vmem:[%s1189_s6 + $0x8] sm:$0xff] }
  0x5c   : > { %339 = vmatpush.msra.mxu0 %v307_v17  ;;  %764 = vmatpush.msra.mxu3 %v307_v17 }
  0x5d   : > { %405 = vmatpush.msra.mxu1 %v306_v18 }
  0x5e   : > { %340 = vmatpush.msra.mxu0 %v305_v19  ;;  %765 = vmatpush.msra.mxu3 %v305_v19 }
  0x5f   : > { %406 = vmatpush.msra.mxu1 %v304_v20 }
  0x60   : > { %341 = vmatpush.msra.mxu0 %v303_v21  ;;  %766 = vmatpush.msra.mxu3 %v303_v21 }
  0x61   : > { %407 = vmatpush.msra.mxu1 %v302_v22 }
  0x62   : > { %342 = vmatpush.msra.mxu0 %v301_v23  ;;  %767 = vmatpush.msra.mxu3 %v301_v23 }
  0x63   : > { %408 = vmatpush.msra.mxu1 %v300_v24 }
  0x64   : > { %343 = vmatpush.msra.mxu0 %v299_v25  ;;  %768 = vmatpush.msra.mxu3 %v299_v25  ;;  %v464_v25 = vld [vmem:[%s1189_s6 + $0x18] sm:$0xff] }
  0x65   : > { %409 = vmatpush.msra.mxu1 %v298_v26 }
  0x66   : > { %344 = vmatpush.msra.mxu0 %v297_v27  ;;  %769 = vmatpush.msra.mxu3 %v297_v27 }
  0x67   : > { %410 = vmatpush.msra.mxu1 %v296_v28 }
  0x68   : > { %345 = vmatpush.msra.mxu0 %v295_v29  ;;  %770 = vmatpush.msra.mxu3 %v295_v29 }
  0x69   : > { %411 = vmatpush.msra.mxu1 %v294_v30 }
  0x6a   : > { %412 = vmatmul.f32.vlgmr.msra.gmra.mxu1 %v277_v31  ;;  %346 = vmatpush.msra.mxu0 %v293_v32 }
  0x6b   : > { %347 = vmatmul.f32.vlgmr.msra.gmra.mxu0 %v277_v31  ;;  %771 = vmatpush.msra.mxu3 %v293_v32 }
  0x6c   : > { %377 = vmatmul.f32.vlgmr.msra.gmra.mxu3 %v287_v38 }
  0x72   : > { %415 = vmatmul.f32.gmra.mxu1 %v278_v33 }
  0x73   : > { %350 = vmatmul.f32.gmra.mxu0 %v278_v33 }
  0x74   : > { %380 = vmatmul.f32.gmra.mxu3 %v288_v40 }
  0x7a   : > { %418 = vmatmul.f32.gmra.mxu1 %v279_v34 }
  0x7b   : > { %353 = vmatmul.f32.gmra.mxu0 %v279_v34 }
  0x7c   : > { %383 = vmatmul.f32.gmra.mxu3 %v289_v42 }
  0x82   : > { %421 = vmatmul.f32.gmra.mxu1 %v280_v35 }
  0x83   : > { %356 = vmatmul.f32.gmra.mxu0 %v280_v35 }
  0x84   : > { %386 = vmatmul.f32.gmra.mxu3 %v290_v44 }
  0x8a   : > { %424 = vmatmul.f32.gmra.mxu1 %v281_v36 }
  0x8b   : > { %359 = vmatmul.f32.gmra.mxu0 %v281_v36 }
  0x8c   : > { %389 = vmatmul.f32.gmra.mxu3 %v291_v46 }
  0x92   : > { %427 = vmatmul.f32.gmra.mxu1 %v282_v37 }
  0x93   : > { %362 = vmatmul.f32.gmra.mxu0 %v282_v37 }
  0x94   : > { %392 = vmatmul.f32.gmra.mxu3 %v292_v47 }
  0x9a   : > { %430 = vmatmul.f32.gmra.mxu1 %v283_v39 }
  0x9b   : > { %365 = vmatmul.f32.gmra.mxu0 %v283_v39 }
  0xa2   : > { %433 = vmatmul.f32.gmra.mxu1 %v284_v41 }
  0xa3   : > { %368 = vmatmul.f32.gmra.mxu0 %v284_v41 }
  0xaa   : > { %436 = vmatmul.f32.gmra.mxu1 %v285_v43 }
  0xab   : > { %371 = vmatmul.f32.gmra.mxu0 %v285_v43 }
  0xb2   : > { %439 = vmatmul.f32.gmra.mxu1 %v286_v45 }
  0xb3   : > { %374 = vmatmul.f32.gmra.mxu0 %v286_v45 }
  0xba   : > { %442 = vmatmul.f32.gmra.mxu1 %v287_v38 }
  0xc2   : > { %445 = vmatmul.f32.gmra.mxu1 %v288_v40 }
  0xca   : > { %448 = vmatmul.f32.gmra.mxu1 %v289_v42 }
  0xd2   : > { %451 = vmatmul.f32.gmra.mxu1 %v290_v44 }
  0xda   : > { %454 = vmatmul.f32.gmra.mxu1 %v291_v46 }
  0xe2   : > { %457 = vmatmul.f32.gmra.mxu1 %v292_v47 }
  0xe7   : > { %v413_v51 = vpop.f32.mrf.mxu1 }
  0xe8   : > { %v414_v52 = vadd.f32 %v413_v51, %v1225_v49  ;;  %v348_v53 = vpop.f32.mrf.mxu0 }
  0xe9   : > { %v349_v55 = vadd.f32 %v348_v53, %v1227_v50 }
  0xea   : > { %v493_v56 = vmul.f32 -2.0, %v414_v52 }
  0xeb   : > { %v477_v57 = vsub.f32 %v461_v54, %v349_v55 }
  0xec   : > { %v509_v58 = vmul.f32 1.442695, %v493_v56 }
  0xed   : > { %v541_v59 = vmul.f32 %v477_v57, %v477_v57 }
  0xee   : > { %839 = vpow2.f32 %v509_v58 }
  0xef   : > { %v416_v60 = vpop.f32.mrf.mxu1  ;;  %v557_v0 = vmul.f32 0.5, %v541_v59  ;;  %v378_v44 = vpop.f32.mrf.mxu3 }
  0xf0   : > { %v417_v61 = vadd.f32 %v416_v60, %v1225_v49  ;;  %v351_v62 = vpop.f32.mrf.mxu0 }
  0xf1   : > { %v352_v1 = vadd.f32 %v351_v62, %v1227_v50 }
  0xf2   : > { %v494_v2 = vmul.f32 -2.0, %v417_v61 }
  0xf3   : > { %v478_v3 = vsub.f32 %v462_v63, %v352_v1 }
  0xf4   : > { %v840_v4 = vpop.eup %839  ;;  %v511_v5 = vmul.f32 1.442695, %v494_v2  ;;  %v476_v2 = vld [vmem:[%s1189_s6 + $0x78] sm:$0xff] }
  0xf5   : > { %v542_v6 = vmul.f32 %v478_v3, %v478_v3  ;;  %v573_v7 = vmul.f32 %v840_v4, %v557_v0 }
  0xf6   : > { %841 = vpow2.f32 %v511_v5  ;;  %v475_v5 = vld [vmem:[%s1189_s6 + $0x70] sm:$0xff] }
  0xf7   : > { %v419_v8 = vpop.f32.mrf.mxu1  ;;  %v1235_v9 = vadd.f32 %v573_v7, %v414_v52  ;;  %v558_v13 = vmul.f32 0.5, %v542_v6  ;;  %v381_v46 = vpop.f32.mrf.mxu3 }
  0xf8   : > { %v420_v10 = vadd.f32 %v419_v8, %v1225_v49  ;;  %v354_v11 = vpop.f32.mrf.mxu0 }
  0xf9   : > { %v355_v14 = vadd.f32 %v354_v11, %v1227_v50 }
  0xfa   : > { %v495_v15 = vmul.f32 -2.0, %v420_v10 }
  0xfb   : > { %v479_v16 = vsub.f32 %v463_v12, %v355_v14 }
  0xfc   : > { %v842_v17 = vpop.eup %841  ;;  %v513_v18 = vmul.f32 1.442695, %v495_v15  ;;  %v474_v15 = vld [vmem:[%s1189_s6 + $0x68] sm:$0xff] }
  0xfd   : > { %v543_v19 = vmul.f32 %v479_v16, %v479_v16  ;;  %v574_v20 = vmul.f32 %v842_v17, %v558_v13 }
  0xfe   : > { %843 = vpow2.f32 %v513_v18 }
  0xff   : > { %v422_v21 = vpop.f32.mrf.mxu1  ;;  %v1240_v22 = vadd.f32 %v574_v20, %v417_v61  ;;  %v559_v26 = vmul.f32 0.5, %v543_v19  ;;  %v384_v48 = vpop.f32.mrf.mxu3 }
 0x100   : > { %v423_v23 = vadd.f32 %v422_v21, %v1225_v49  ;;  %v357_v24 = vpop.f32.mrf.mxu0 }
 0x101   : > { %v358_v27 = vadd.f32 %v357_v24, %v1227_v50 }
 0x102   : > { %v496_v28 = vmul.f32 -2.0, %v423_v23 }
 0x103   : > { %v480_v29 = vsub.f32 %v464_v25, %v358_v27  ;;  %v382_v27 = vadd.f32 %v381_v46, %v1227_v50 }
 0x104   : > { %v844_v30 = vpop.eup %843  ;;  %v515_v31 = vmul.f32 1.442695, %v496_v28 }
 0x105   : > { %v544_v32 = vmul.f32 %v480_v29, %v480_v29  ;;  %v575_v33 = vmul.f32 %v844_v30, %v559_v26  ;;  %v473_v26 = vld [vmem:[%s1189_s6 + $0x60] sm:$0xff] }
 0x106   : > { %845 = vpow2.f32 %v515_v31  ;;  %v472_v31 = vld [vmem:[%s1189_s6 + $0x58] sm:$0xff] }
 0x107   : > { %v1245_v34 = vpop.f32.mrf.mxu1  ;;  %v1247_v35 = vadd.f32 %v575_v33, %v420_v10  ;;  %v560_v36 = vmul.f32 0.5, %v544_v32  ;;  %v387_v53 = vpop.f32.mrf.mxu3 }
 0x108   : > { %v1259_v51 = vpop.f32.mrf.mxu0  ;;  %v388_v13 = vadd.f32 %v387_v53, %v1227_v50  ;;  %v488_v53 = vsub.f32 %v472_v31, %v382_v27  ;;  %v468_v31 = vld [vmem:[%s1189_s6 + $0x38] sm:$0xff] }
 0x10a   : > { %v490_v24 = vsub.f32 %v474_v15, %v388_v13 }
 0x10c   : > { %v846_v37 = vpop.eup %845 }
 0x10d   : > { %v576_v38 = vmul.f32 %v846_v37, %v560_v36  ;;  %v554_v37 = vmul.f32 %v490_v24, %v490_v24 }
 0x10f   : > { %v1249_v39 = vpop.f32.mrf.mxu1  ;;  %v1251_v40 = vadd.f32 %v576_v38, %v423_v23  ;;  %v390_v57 = vpop.f32.mrf.mxu3  ;;  %v385_v23 = vadd.f32 %v384_v48, %v1227_v50 }
 0x110   : > { %v1261_v55 = vpop.f32.mrf.mxu0  ;;  %v391_v3 = vadd.f32 %v390_v57, %v1227_v50 }
 0x111   : > { %v489_v36 = vsub.f32 %v473_v26, %v385_v23  ;;  %v469_v26 = vld [vmem:[%s1189_s6 + $0x40] sm:$0xff] }
 0x112   : > { %v491_v14 = vsub.f32 %v475_v5, %v391_v3 }
 0x114   : > { %v555_v25 = vmul.f32 %v491_v14, %v491_v14  ;;  %v470_v14 = vld [vmem:[%s1189_s6 + $0x48] sm:$0xff] }
 0x116   : > { %v571_v38 = vmul.f32 0.5, %v555_v25 }
 0x117   : > { %v1253_v41 = vpop.f32.mrf.mxu1  ;;  %v393_v61 = vpop.f32.mrf.mxu3 }
 0x118   : > { %v1263_v58 = vpop.f32.mrf.mxu0  ;;  %v394_v0 = vadd.f32 %v393_v61, %v1227_v50  ;;  %v570_v61 = vmul.f32 0.5, %v554_v37 }
 0x11a   : > { %v492_v8 = vsub.f32 %v476_v2, %v394_v0 }
 0x11c   : > { %v556_v17 = vmul.f32 %v492_v8, %v492_v8 }
 0x11e   : > { %v572_v28 = vmul.f32 0.5, %v556_v17 }
 0x11f   : > { %v1255_v42 = vpop.f32.mrf.mxu1 }
 0x120   : > { %v1268_v62 = vpop.f32.mrf.mxu0 }
 0x121   : > { %v370_v27 = vadd.f32 %v1268_v62, %v1227_v50  ;;  %v367_v62 = vadd.f32 %v1263_v58, %v1227_v50  ;;  %v364_v58 = vadd.f32 %v1261_v55, %v1227_v50 }
 0x127   : > { %v1257_v43 = vpop.f32.mrf.mxu1 }
 0x128   : > { %v372_v18 = vpop.f32.mrf.mxu0 }
 0x129   : > { %v373_v17 = vadd.f32 %v372_v18, %v1227_v50 }
 0x12f   : > { %v440_v45 = vpop.f32.mrf.mxu1 }
 0x130   : > { %v1299_v46 = vadd.f32 %v440_v45, %v1225_v49  ;;  %v375_v3 = vpop.f32.mrf.mxu0 }
 0x131   : > { %v376_v8 = vadd.f32 %v375_v3, %v1227_v50 }
 0x132   : > { %v502_v45 = vmul.f32 -2.0, %v1299_v46 }
 0x137   : > { %v443_v47 = vpop.f32.mrf.mxu1 }
 0x138   : > { %v1293_v29 = vadd.f32 %v443_v47, %v1225_v49 }
 0x13a   : > { %v503_v47 = vmul.f32 -2.0, %v1293_v29 }
 0x13c   : > { %v529_v5 = vmul.f32 1.442695, %v503_v47 }
 0x13f   : > { %v446_v52 = vpop.f32.mrf.mxu1 }
 0x140   : > { %v1286_v19 = vadd.f32 %v446_v52, %v1225_v49  ;;  %v379_v52 = vadd.f32 %v378_v44, %v1227_v50  ;;  %v1305_v44 = vadd.f32 %v1257_v43, %v1225_v49  ;;  %v1313_v43 = vadd.f32 %v1255_v42, %v1225_v49 }
 0x141   : > { %v1321_v42 = vadd.f32 %v1253_v41, %v1225_v49  ;;  %v429_v41 = vadd.f32 %v1249_v39, %v1225_v49  ;;  %v426_v39 = vadd.f32 %v1245_v34, %v1225_v49 }
 0x142   : > { %v504_v30 = vmul.f32 -2.0, %v1286_v19  ;;  %v500_v18 = vmul.f32 -2.0, %v1313_v43 }
 0x144   : > { %v531_v57 = vmul.f32 1.442695, %v504_v30 }
 0x147   : > { %v449_v54 = vpop.f32.mrf.mxu1 }
 0x148   : > { %v1280_v10 = vadd.f32 %v449_v54, %v1225_v49 }
 0x14a   : > { %v505_v20 = vmul.f32 -2.0, %v1280_v10 }
 0x14c   : > { %v533_v32 = vmul.f32 1.442695, %v505_v20  ;;  %v527_v20 = vmul.f32 1.442695, %v502_v45 }
 0x14f   : > { %v452_v56 = vpop.f32.mrf.mxu1 }
 0x150   : > { %v1273_v1 = vadd.f32 %v452_v56, %v1225_v49  ;;  %v471_v56 = vld [vmem:[%s1189_s6 + $0x50] sm:$0xff] }
 0x152   : > { %v506_v11 = vmul.f32 -2.0, %v1273_v1 }
 0x154   : > { %v535_v21 = vmul.f32 1.442695, %v506_v11 }
 0x157   : > { %v455_v59 = vpop.f32.mrf.mxu1 }
 0x158   : > { %v1266_v60 = vadd.f32 %v455_v59, %v1225_v49  ;;  %v553_v59 = vmul.f32 %v489_v36, %v489_v36 }
 0x15a   : > { %v507_v63 = vmul.f32 -2.0, %v1266_v60  ;;  %v569_v11 = vmul.f32 0.5, %v553_v59  ;;  %v498_v59 = vmul.f32 -2.0, %v429_v41 }
 0x15c   : > { %v537_v7 = vmul.f32 1.442695, %v507_v63  ;;  %v519_v34 = vmul.f32 1.442695, %v498_v59 }
 0x15e   : > { %847 = vpow2.f32 %v537_v7  ;;  %v552_v7 = vmul.f32 %v488_v53, %v488_v53  ;;  %v467_v53 = vld [vmem:[%s1189_s6 + $0x30] sm:$0xff] }
 0x15f   : > { %v458_v4 = vpop.f32.mrf.mxu1 }
 0x160   : > { %v459_v6 = vadd.f32 %v458_v4, %v1225_v49  ;;  %v487_v4 = vsub.f32 %v471_v56, %v379_v52  ;;  %v568_v23 = vmul.f32 0.5, %v552_v7  ;;  %v484_v52 = vsub.f32 %v468_v31, %v370_v27  ;;  %v465_v7 = vld [vmem:[%s1189_s6 + $0x20] sm:$0xff] }
 0x161   : > { %v497_v49 = vmul.f32 -2.0, %v426_v39 }
 0x162   : > { %v508_v12 = vmul.f32 -2.0, %v459_v6  ;;  %v551_v15 = vmul.f32 %v487_v4, %v487_v4 }
 0x164   : > { %v539_v16 = vmul.f32 1.442695, %v508_v12  ;;  %v848_v33 = vpop.eup %847  ;;  %v567_v30 = vmul.f32 0.5, %v551_v15 }
 0x165   : > { %v587_v0 = vmul.f32 %v848_v33, %v571_v38  ;;  %v499_v38 = vmul.f32 -2.0, %v1321_v42 }
 0x166   : > { %849 = vpow2.f32 %v539_v16  ;;  %v501_v16 = vmul.f32 -2.0, %v1305_v44 }
 0x167   : > { %851 = vpow2.f32 %v535_v21  ;;  %v486_v21 = vsub.f32 %v470_v14, %v376_v8  ;;  %v517_v14 = vmul.f32 1.442695, %v497_v49 }
 0x168   : > { %853 = vpow2.f32 %v533_v32  ;;  %v485_v32 = vsub.f32 %v469_v26, %v373_v17 }
 0x169   : > { %855 = vpow2.f32 %v531_v57 }
 0x16a   : > { %857 = vpow2.f32 %v529_v5  ;;  %v361_v5 = vadd.f32 %v1259_v51, %v1227_v50 }
 0x16b   : > { %859 = vpow2.f32 %v527_v20 }
 0x16c   : > { %v850_v48 = vpop.eup %849 }
 0x16d   : > { %v588_v54 = vmul.f32 %v850_v48, %v572_v28  ;;  %v852_v2 = vpop.eup %851  ;;  %v525_v28 = vmul.f32 1.442695, %v501_v16  ;;  %v523_v48 = vmul.f32 1.442695, %v500_v18 }
 0x16e   : > { %v586_v12 = vmul.f32 %v852_v2, %v570_v61  ;;  %v854_v13 = vpop.eup %853  ;;  %v521_v61 = vmul.f32 1.442695, %v499_v38  ;;  %v548_v2 = vmul.f32 %v484_v52, %v484_v52 }
 0x16f   : > { %v604_v63 = vadd.f32 %v588_v54, %v459_v6  ;;  %v603_v6 = vadd.f32 %v587_v0, %v1266_v60  ;;  %v585_v24 = vmul.f32 %v854_v13, %v569_v11  ;;  %v856_v25 = vpop.eup %855  ;;  %861 = vpow2.f32 %v525_v28  ;;  %v466_v0 = vld [vmem:[%s1189_s6 + $0x28] sm:$0xff] }
 0x170   : > { %v602_v60 = vadd.f32 %v586_v12, %v1273_v1  ;;  %v550_v1 = vmul.f32 %v486_v21, %v486_v21  ;;  %v584_v36 = vmul.f32 %v856_v25, %v568_v23  ;;  %v858_v37 = vpop.eup %857  ;;  %v549_v54 = vmul.f32 %v485_v32, %v485_v32 }
 0x171   : > { %605 = vmatpush.xpose.msra.mxu2 %v604_v63  ;;  %v601_v33 = vadd.f32 %v585_v24, %v1280_v10  ;;  %v583_v56 = vmul.f32 %v858_v37, %v567_v30  ;;  %v860_v57 = vpop.eup %859  ;;  %v483_v63 = vsub.f32 %v467_v53, %v367_v62  ;;  %863 = vpow2.f32 %v523_v48 }
 0x172   : > { %v566_v47 = vmul.f32 0.5, %v550_v1  ;;  %v600_v10 = vadd.f32 %v584_v36, %v1286_v19  ;;  %v565_v3 = vmul.f32 0.5, %v549_v54  ;;  %v482_v55 = vsub.f32 %v466_v0, %v364_v58 }
 0x173   : > { %v599_v4 = vadd.f32 %v583_v56, %v1293_v29  ;;  %865 = vpow2.f32 %v521_v61  ;;  %v547_v8 = vmul.f32 %v483_v63, %v483_v63  ;;  %v564_v11 = vmul.f32 0.5, %v548_v2 }
 0x174   : > { %v582_v19 = vmul.f32 %v860_v57, %v566_v47  ;;  %v481_v29 = vsub.f32 %v465_v7, %v361_v5  ;;  %867 = vpow2.f32 %v519_v34  ;;  %v546_v15 = vmul.f32 %v482_v55, %v482_v55 }
 0x175   : > { %606 = vmatpush.xpose.msra.mxu2 %v603_v6  ;;  %v862_v45 = vpop.eup %861  ;;  %v563_v16 = vmul.f32 0.5, %v547_v8  ;;  %869 = vpow2.f32 %v517_v14 }
 0x176   : > { %v598_v6 = vadd.f32 %v582_v19, %v1299_v46  ;;  %v581_v12 = vmul.f32 %v862_v45, %v565_v3  ;;  %v545_v20 = vmul.f32 %v481_v29, %v481_v29  ;;  %v562_v21 = vmul.f32 0.5, %v546_v15 }
 0x177   : > { %v864_v13 = vpop.eup %863 }
 0x178   : > { %v597_v50 = vadd.f32 %v581_v12, %v1305_v44  ;;  %v580_v51 = vmul.f32 %v864_v13, %v564_v11  ;;  %v561_v24 = vmul.f32 0.5, %v545_v20 }
 0x179   : > { %607 = vmatpush.xpose.msra.mxu2 %v602_v60  ;;  %v866_v17 = vpop.eup %865 }
 0x17a   : > { %v596_v23 = vadd.f32 %v580_v51, %v1313_v43  ;;  %v579_v60 = vmul.f32 %v866_v17, %v563_v16  ;;  %v868_v46 = vpop.eup %867  ;;  %v1042_v43 = vmov 1.0  }
 0x17b   : > { %v578_v26 = vmul.f32 %v868_v46, %v562_v21  ;;  %v870_v27 = vpop.eup %869 }
 0x17c   : > { %v595_v25 = vadd.f32 %v579_v60, %v1321_v42  ;;  %v577_v18 = vmul.f32 %v870_v27, %v561_v24 }
 0x17d   : > { %608 = vmatpush.xpose.msra.mxu2 %v601_v33  ;;  %v594_v44 = vadd.f32 %v578_v26, %v429_v41 }
 0x17e   : > { %v593_v28 = vadd.f32 %v577_v18, %v426_v39 }
 0x181   : > { %609 = vmatpush.xpose.msra.mxu2 %v600_v10 }
 0x185   : > { %610 = vmatpush.xpose.msra.mxu2 %v599_v4 }
 0x189   : > { %611 = vmatpush.xpose.msra.mxu2 %v598_v6 }
 0x18d   : > { %612 = vmatpush.xpose.msra.mxu2 %v597_v50 }
 0x191   : > { %613 = vmatpush.xpose.msra.mxu2 %v596_v23 }
 0x195   : > { %614 = vmatpush.xpose.msra.mxu2 %v595_v25 }
 0x199   : > { %615 = vmatpush.xpose.msra.mxu2 %v594_v44 }
 0x19d   : > { %616 = vmatpush.xpose.msra.mxu2 %v593_v28 }
 0x1a1   : > { %617 = vmatpush.xpose.msra.mxu2 %v1251_v40 }
 0x1a5   : > { %618 = vmatpush.xpose.msra.mxu2 %v1247_v35 }
 0x1a9   : > { %619 = vmatpush.xpose.msra.mxu2 %v1240_v22 }
 0x1ad   : > { %620 = vmatpush.xpose.msra.mxu2 %v1235_v9 }
 0x1b0   : > { %621 = vmatmul.f32.vlgmr.msra.gmra.mxu2 %v1042_v43 }
 0x233   : > { %v622_v42 = vpop.f32.mrf.mxu2 }
 0x234   : > { %v625_v30 = vsub.f32 -58.812065, %v622_v42 }
 0x236   : > { %626 = vst [vmem:[%s274_s20] sm:$0x1] %v625_v30 }
 0x237   : > { %988 = shalt.err (!%p985_p11)
}
 0x238   : > { %780 = dma.vmem_to_hbm [thread:$0]  (%p1135_p7), %s639_s2, 16, %s641_s7, %s628_s13  }
 0x239 PF: > { %s652_s8 = sand.u32 1, %s1023_s15   ;;  %p1401_p12 = scmp.ge.s32.totalorder %s1035_s18, 2 }
 0x23a   : > { %s653_s6 = scalar_lea.sflag [#allocation4], %s652_s8 }
 0x23b   : > { %p794_p13 = pnand %p1401_p12, %p1103_p6 }
 0x23d   : > { %p795_p0 = pneg %p794_p13 }
 0x23f   : > { %1018 = dma.done.wait (%p795_p0), %s653_s6, 16  }
 0x240   : > { %1020 = vsyncadd (%p795_p0), %s653_s6, 4294967280  ;;  %s1402_s0 = sld [smem:[#allocation13_spill]]  ;;  %p20_p3 = scmp.ge.s32.totalorder %s1121_s29, 4  }
 0x241   : > { %s1403_s15 = smov %s1027_s16  ;;  %s1404_s16 = smov %s1031_s17 }
 0x242   : > { %s1406_s18 = smov %s1121_s29  ;;  %22 = sbr.rel (!%p20_p3) target bundleno = 10 (0xa), region = 98 }
 0x246   : > { %s1405_s17 = smov %s1402_s0 }
 0x247   :  { %658 = vsyncpa [#allocation3], 1 }
 0x248   :  { %660 = vsyncpa [#allocation3 + $0x1], 1 }
 0x249   :  { %661 = vsyncpa [#allocation6], 1 }
 0x24a   :  { %663 = vsyncpa [#allocation6 + $0x1], 1 }
 0x24b   :  { %664 = vsyncpa [#allocation4], 1 }
 0x24c   :  { %666 = vsyncpa [#allocation4 + $0x1], 1 }

</bundles_post_ra>
